<compile_context>
chip_gen: v5e
topology: v5e:2x2
jax: 0.10.0
libtpu: 0.0.40
codegen_flags: <defaults>
</compile_context>

<pallas_src>
import math
import functools

import jax
import jax.numpy as jnp
from jax.experimental import pallas as pl
from jax.experimental.pallas import tpu as pltpu


# ----------------------------- kernels --------------------------------------


def _rnnc_kernel_track(x_ref, hd_ref, wih_ref, wlat_ref, b_ref, out_ref, pre_ref):
    # Two MXU matmuls accumulated in f32, bias broadcast, tanh on the EUP.
    pre = (
        jnp.dot(x_ref[...], wih_ref[...], preferred_element_type=jnp.float32)
        + jnp.dot(hd_ref[...], wlat_ref[...], preferred_element_type=jnp.float32)
        + b_ref[...].astype(jnp.float32)  # (1, tn) broadcasts over tm rows
    )
    pre_ref[...] = pre.astype(pre_ref.dtype)
    out_ref[...] = jnp.tanh(pre).astype(out_ref.dtype)


def _rnnc_kernel_notrack(x_ref, hd_ref, wih_ref, wlat_ref, b_ref, out_ref):
    pre = (
        jnp.dot(x_ref[...], wih_ref[...], preferred_element_type=jnp.float32)
        + jnp.dot(hd_ref[...], wlat_ref[...], preferred_element_type=jnp.float32)
        + b_ref[...].astype(jnp.float32)
    )
    out_ref[...] = jnp.tanh(pre).astype(out_ref.dtype)


# ----------------------------- planning --------------------------------------


def _round_up(x, m):
    return (x + m - 1) // m * m


def _tpu_profile():
    """Trace-time hardware query: (vmem_capacity_bytes, is_v5). Safe fallbacks."""
    kind = ""
    try:
        kind = jax.devices()[0].device_kind.lower()
    except Exception:
        pass
    vmem_cap = None
    try:
        vmem_cap = int(pltpu.get_tpu_info().vmem_capacity_bytes)
    except Exception:
        vmem_cap = None
    if vmem_cap is None:
        vmem_cap = 64 * 2**20 if "v7" in kind else 128 * 2**20
    return vmem_cap, ("v5" in kind)


def _plan(n, input_size, hidden_size, itemsize, n_out):
    """Pick tile sizes, padding, grid order and VMEM budget from static shapes."""
    vmem_cap, is_v5 = _tpu_profile()
    if vmem_cap >= 128 * 2**20:          # v5e / v6e: 128 MiB physical
        vmem_limit = 100 * 2**20
        tn_cap = 1024
    else:                                 # v7x: 64 MiB physical per TC
        vmem_limit = max(32 * 2**20, vmem_cap - 16 * 2**20)
        tn_cap = 512
    budget = vmem_limit - 4 * 2**20      # headroom for compiler scratch

    h_pad = _round_up(hidden_size, 128)

    # Full-height M tile; pad the batch up to it instead of shrinking the tile
    # to a divisor of the batch. v5e's MXU is 128-wide, so tm=256 buys nothing.
    tm_target = 128 if is_v5 else 256
    tm = min(tm_target, _round_up(n, 8))

    in_lanes = _round_up(input_size, 128)   # lane padding of the x tile
    in_subl = _round_up(input_size, 8)      # sublane padding of the W_ih panel

    def vmem_bytes(tm_, tn_):
        # Everything is double-buffered by the BlockSpec pipeline.
        return 2 * itemsize * (
            tm_ * in_lanes          # x tile
            + tm_ * h_pad           # hidden_delayed tile
            + in_subl * tn_         # W_ih column panel
            + h_pad * tn_           # W_lat column panel
            + 8 * tn_               # bias panel
            + n_out * tm_ * tn_     # output tile(s)
        )

    cand = []
    if h_pad <= tn_cap:
        cand.append(h_pad)                # whole hidden dim in one panel
    for c in (1024, 512, 256, 128):
        if c <= tn_cap and c < h_pad and h_pad % c == 0:
            cand.append(c)

    tn = None
    for c in cand:
        if vmem_bytes(tm, c) <= budget:
            tn = c
            break
    if tn is None:
        tn = cand[-1]
        while tm > 8 and vmem_bytes(tm, tn) > budget:
            tm = max(8, _round_up(tm // 2, 8))
        # TODO(synk): K-tile the hidden reduction if even this overflows VMEM.

    n_pad = _round_up(n, tm)
    ni, nj = n_pad // tm, h_pad // tn

    # Trace-time loop-order choice (minimize total HBM element traffic):
    #   j-outer: weight panels streamed once, activations streamed nj times.
    #   i-outer: activations streamed once, weights streamed ni times.
    w_elems = (input_size + h_pad) * h_pad
    a_elems = n_pad * (input_size + h_pad)
    j_outer = (w_elems + nj * a_elems) <= (ni * w_elems + a_elems)

    if j_outer:
        grid = (nj, ni)
        row_map = lambda j, i: (i, 0)     # x, hidden_delayed
        col_map = lambda j, i: (0, j)     # W_ih, W_lat, bias
        out_map = lambda j, i: (i, j)
    else:
        grid = (ni, nj)
        row_map = lambda i, j: (i, 0)
        col_map = lambda i, j: (0, j)
        out_map = lambda i, j: (i, j)

    # Megacore: shard the outer axis (whichever tensor dominates traffic stays
    # disjoint across the two cores); inner axis stays "arbitrary".
    sem = ("parallel", "arbitrary") if grid[0] >= 2 else ("arbitrary", "parallel")

    return tm, tn, n_pad, h_pad, grid, row_map, col_map, out_map, sem, vmem_limit


# ----------------------------- wrapper ---------------------------------------


@functools.partial(jax.jit, static_argnames=("track",))
def rnnc_forward(x, hidden, hidden_delayed, weight_ih, weight_lat, bias, track=False):
    del hidden  # not used in the forward math (same as the PyTorch module)

    n, input_size = x.shape
    hidden_size = weight_ih.shape[1]
    dtype = x.dtype
    itemsize = jnp.dtype(dtype).itemsize
    n_out = 2 if track else 1

    (tm, tn, n_pad, h_pad, grid, row_map, col_map, out_map, sem,
     vmem_limit) = _plan(n, input_size, hidden_size, itemsize, n_out)

    dn, dh = n_pad - n, h_pad - hidden_size

    # Zero padding is exact: padded rows of W_lat meet zero-padded columns of
    # hidden_delayed; padded output rows/columns are sliced off below.
    # All pads are guarded so they're elided entirely for aligned shapes.
    x_p = jnp.pad(x, ((0, dn), (0, 0))) if dn else x
    hd_p = (jnp.pad(hidden_delayed, ((0, dn), (0, dh)))
            if (dn or dh) else hidden_delayed)
    wih_p = jnp.pad(weight_ih, ((0, 0), (0, dh))) if dh else weight_ih
    wlat_p = jnp.pad(weight_lat, ((0, dh), (0, dh))) if dh else weight_lat
    b_p = jnp.pad(bias, ((0, 0), (0, dh))) if dh else bias

    in_specs = [
        pl.BlockSpec((tm, input_size), row_map),   # x tile
        pl.BlockSpec((tm, h_pad), row_map),        # hidden_delayed tile
        pl.BlockSpec((input_size, tn), col_map),   # W_ih column panel
        pl.BlockSpec((h_pad, tn), col_map),        # W_lat column panel
        pl.BlockSpec((1, tn), col_map),            # bias panel
    ]
    out_block = pl.BlockSpec((tm, tn), out_map)

    compiler_params = pltpu.CompilerParams(
        dimension_semantics=sem,
        vmem_limit_bytes=int(vmem_limit),
    )
    cost = pl.CostEstimate(
        flops=int(2 * n_pad * h_pad * (input_size + h_pad)),
        transcendentals=int(n_pad * h_pad),
        bytes_accessed=int(itemsize * (
            (input_size + h_pad) * h_pad          # weights
            + h_pad                               # bias
            + n_pad * (input_size + h_pad)        # activations in
            + n_out * n_pad * h_pad               # outputs
        )),
    )

    if track:
        out_p, pre_p = pl.pallas_call(
            _rnnc_kernel_track,
            out_shape=(
                jax.ShapeDtypeStruct((n_pad, h_pad), dtype),
                jax.ShapeDtypeStruct((n_pad, h_pad), dtype),
            ),
            grid=grid,
            in_specs=in_specs,
            out_specs=(out_block, out_block),
            compiler_params=compiler_params,
            cost_estimate=cost,
        )(x_p, hd_p, wih_p, wlat_p, b_p)
        if dn or dh:
            return out_p[:n, :hidden_size], pre_p[:n, :hidden_size]
        return out_p, pre_p

    out_p = pl.pallas_call(
        _rnnc_kernel_notrack,
        out_shape=jax.ShapeDtypeStruct((n_pad, h_pad), dtype),
        grid=grid,
        in_specs=in_specs,
        out_specs=out_block,
        compiler_params=compiler_params,
        cost_estimate=cost,
    )(x_p, hd_p, wih_p, wlat_p, b_p)
    return out_p[:n, :hidden_size] if (dn or dh) else out_p


# ----------------------------- init ------------------------------------------


def init_rnnc_params(key, input_size, hidden_size, bias=True, dtype=jnp.float32):
    # Matches torch init: uniform(-sqrt(1/H), sqrt(1/H)) for weights (and bias if used).
    bound = math.sqrt(1.0 / hidden_size)
    k1, k2, k3 = jax.random.split(key, 3)
    weight_ih = jax.random.uniform(
        k1, (input_size, hidden_size), dtype, minval=-bound, maxval=bound
    )
    weight_lat = jax.random.uniform(
        k2, (hidden_size, hidden_size), dtype, minval=-bound, maxval=bound
    )
    if bias:
        b = jax.random.uniform(
            k3, (1, hidden_size), dtype, minval=-bound, maxval=bound
        )
    else:
        b = jnp.zeros((1, hidden_size), dtype)
    return weight_ih, weight_lat, b


# ----------------------------- demo / check ----------------------------------


if __name__ == "__main__":
    key = jax.random.PRNGKey(0)
    kp, kx, kh, kd, kp2, kx2, kd2 = jax.random.split(key, 7)

    # --- main check: small aligned-ish shapes ---
    batch, input_size, hidden_size = 8, 16, 32
    weight_ih, weight_lat, bias = init_rnnc_params(kp, input_size, hidden_size, bias=True)
    x = jax.random.normal(kx, (batch, input_size), jnp.float32)
    hidden = jax.random.normal(kh, (batch, hidden_size), jnp.float32)  # unused in math
    hidden_delayed = jax.random.normal(kd, (batch, hidden_size), jnp.float32)

    out, pre = rnnc_forward(x, hidden, hidden_delayed, weight_ih, weight_lat, bias, track=True)
    out_only = rnnc_forward(x, hidden, hidden_delayed, weight_ih, weight_lat, bias, track=False)
    jax.block_until_ready((out, pre, out_only))

    pre_ref = x @ weight_ih + hidden_delayed @ weight_lat + bias
    out_ref = jnp.tanh(pre_ref)
    assert jnp.allclose(pre, pre_ref, atol=1e-5, rtol=1e-5)
    assert jnp.allclose(out, out_ref, atol=1e-5, rtol=1e-5)
    assert jnp.allclose(out_only, out_ref, atol=1e-5, rtol=1e-5)

    # --- padding-path check: awkward, non-aligned shapes ---
    b2, in2, h2 = 5, 7, 40
    w_ih2, w_lat2, bias2 = init_rnnc_params(kp2, in2, h2, bias=True)
    x2 = jax.random.normal(kx2, (b2, in2), jnp.float32)
    hd2 = jax.random.normal(kd2, (b2, h2), jnp.float32)
    out2, pre2 = rnnc_forward(x2, jnp.zeros_like(hd2), hd2, w_ih2, w_lat2, bias2, track=True)
    jax.block_until_ready((out2, pre2))
    pre2_ref = x2 @ w_ih2 + hd2 @ w_lat2 + bias2
    assert jnp.allclose(pre2, pre2_ref, atol=1e-5, rtol=1e-5)
    assert jnp.allclose(out2, jnp.tanh(pre2_ref), atol=1e-5, rtol=1e-5)

    print("KERNEL_OK")
</pallas_src>

<mosaic_0001>
module attributes {stable_mosaic.version = 11 : i64} {
  func.func @_rnnc_kernel_track(%arg0: i32, %arg1: i32, %arg2: memref<8x16xf32, #tpu.memory_space<vmem>>, %arg3: memref<8x128xf32, #tpu.memory_space<vmem>>, %arg4: memref<16x128xf32, #tpu.memory_space<vmem>>, %arg5: memref<128x128xf32, #tpu.memory_space<vmem>>, %arg6: memref<1x128xf32, #tpu.memory_space<vmem>>, %arg7: memref<8x128xf32, #tpu.memory_space<vmem>>, %arg8: memref<8x128xf32, #tpu.memory_space<vmem>>) attributes {dimension_semantics = [#tpu.dimension_semantics<arbitrary>, #tpu.dimension_semantics<parallel>], iteration_bounds = array<i64: 1, 1>, scalar_prefetch = 0 : i64, scratch_operands = 0 : i64, tpu.core_type = #tpu.core_type<tc>, window_params = [{transform_indices = @transform_0, window_bounds = array<i64: 8, 16>}, {transform_indices = @transform_1, window_bounds = array<i64: 8, 128>}, {transform_indices = @transform_2, window_bounds = array<i64: 16, 128>}, {transform_indices = @transform_3, window_bounds = array<i64: 128, 128>}, {transform_indices = @transform_4, window_bounds = array<i64: 1, 128>}, {transform_indices = @transform_5, window_bounds = array<i64: 8, 128>}, {transform_indices = @transform_6, window_bounds = array<i64: 8, 128>}]} {
    %c0 = arith.constant 0 : index
    %c0_0 = arith.constant 0 : index
    %0 = vector.load %arg2[%c0, %c0_0] : memref<8x16xf32, #tpu.memory_space<vmem>>, vector<8x16xf32>
    %c0_1 = arith.constant 0 : index
    %c0_2 = arith.constant 0 : index
    %1 = vector.load %arg4[%c0_1, %c0_2] : memref<16x128xf32, #tpu.memory_space<vmem>>, vector<16x128xf32>
    %cst = arith.constant dense<0.000000e+00> : vector<8x128xf32>
    %2 = tpu.matmul %0, %1, %cst {dimension_numbers = #tpu.dot_dimension_numbers<[1], [0], [0], [1], [0, 0, 1, 1], [], []>} : vector<8x16xf32>, vector<16x128xf32>, vector<8x128xf32> -> vector<8x128xf32>
    %c0_3 = arith.constant 0 : index
    %c0_4 = arith.constant 0 : index
    %3 = vector.load %arg3[%c0_3, %c0_4] : memref<8x128xf32, #tpu.memory_space<vmem>>, vector<8x128xf32>
    %c0_5 = arith.constant 0 : index
    %c0_6 = arith.constant 0 : index
    %4 = vector.load %arg5[%c0_5, %c0_6] : memref<128x128xf32, #tpu.memory_space<vmem>>, vector<128x128xf32>
    %cst_7 = arith.constant dense<0.000000e+00> : vector<8x128xf32>
    %5 = tpu.matmul %3, %4, %cst_7 {dimension_numbers = #tpu.dot_dimension_numbers<[1], [0], [0], [1], [0, 0, 1, 1], [], []>} : vector<8x128xf32>, vector<128x128xf32>, vector<8x128xf32> -> vector<8x128xf32>
    %6 = arith.addf %2, %5 : vector<8x128xf32>
    %c0_8 = arith.constant 0 : index
    %c0_9 = arith.constant 0 : index
    %7 = vector.load %arg6[%c0_8, %c0_9] : memref<1x128xf32, #tpu.memory_space<vmem>>, vector<1x128xf32>
    %8 = vector.broadcast %7 : vector<1x128xf32> to vector<8x128xf32>
    %9 = arith.addf %6, %8 : vector<8x128xf32>
    %c0_10 = arith.constant 0 : index
    %c0_11 = arith.constant 0 : index
    %10 = vector.load %arg8[%c0_10, %c0_11] : memref<8x128xf32, #tpu.memory_space<vmem>>, vector<8x128xf32>
    tpu.vector_store %arg8[%c0_10, %c0_11], %9 {strides = array<i32>} : memref<8x128xf32, #tpu.memory_space<vmem>>, vector<8x128xf32>,
    %11 = math.tanh %9 : vector<8x128xf32>
    %c0_12 = arith.constant 0 : index
    %c0_13 = arith.constant 0 : index
    %12 = vector.load %arg7[%c0_12, %c0_13] : memref<8x128xf32, #tpu.memory_space<vmem>>, vector<8x128xf32>
    tpu.vector_store %arg7[%c0_12, %c0_13], %11 {strides = array<i32>} : memref<8x128xf32, #tpu.memory_space<vmem>>, vector<8x128xf32>,
    return
  }
  func.func @transform_0(%arg0: i32, %arg1: i32) -> (i32, i32) {
    %c0_i32 = arith.constant 0 : i32
    %c0_i32_0 = arith.constant 0 : i32
    return %arg1, %c0_i32 : i32, i32
  }
  func.func @transform_1(%arg0: i32, %arg1: i32) -> (i32, i32) {
    %c0_i32 = arith.constant 0 : i32
    %c0_i32_0 = arith.constant 0 : i32
    return %arg1, %c0_i32 : i32, i32
  }
  func.func @transform_2(%arg0: i32, %arg1: i32) -> (i32, i32) {
    %c0_i32 = arith.constant 0 : i32
    %c0_i32_0 = arith.constant 0 : i32
    return %c0_i32, %arg0 : i32, i32
  }
  func.func @transform_3(%arg0: i32, %arg1: i32) -> (i32, i32) {
    %c0_i32 = arith.constant 0 : i32
    %c0_i32_0 = arith.constant 0 : i32
    return %c0_i32, %arg0 : i32, i32
  }
  func.func @transform_4(%arg0: i32, %arg1: i32) -> (i32, i32) {
    %c0_i32 = arith.constant 0 : i32
    %c0_i32_0 = arith.constant 0 : i32
    return %c0_i32, %arg0 : i32, i32
  }
  func.func @transform_5(%arg0: i32, %arg1: i32) -> (i32, i32) {
    %c0_i32 = arith.constant 0 : i32
    return %arg1, %arg0 : i32, i32
  }
  func.func @transform_6(%arg0: i32, %arg1: i32) -> (i32, i32) {
    %c0_i32 = arith.constant 0 : i32
    return %arg1, %arg0 : i32, i32
  }
}

</mosaic_0001>

<bundles_post_ra>
// kernel: rnnc_forward.1
= control target key start
LH: loop header
LB: loop body
LE: loop exit
PB: predicated region body
PF: predicated region fallthrough
CT: control target
= control target key end

     0   :  { %12 = vsyncpa [#allocation3], 0  ;;  %vm64_vm0 = vcmask 130048   ;;  %s292_s0 = inlined_call_operand.vmem [shape: f32[8,16], index: 0, kind: input, shape index: {}]   ;;  %s293_s1 = inlined_call_operand.vmem [shape: f32[8,128], index: 1, kind: input, shape index: {}]   ;;  %s294_s2 = inlined_call_operand.vmem [shape: f32[16,128], index: 2, kind: input, shape index: {}]   ;;  %s295_s3 = inlined_call_operand.vmem [shape: f32[128,128], index: 3, kind: input, shape index: {}]   ;;  %s296_s4 = inlined_call_operand.vmem [shape: f32[1,128], index: 4, kind: input, shape index: {}]   ;;  %s297_s5 = inlined_call_operand.hbm [shape: f32[8,128], index: 5, kind: output, shape index: {0}]   ;;  %s298_s6 = inlined_call_operand.hbm [shape: f32[8,128], index: 6, kind: output, shape index: {1}]  }
   0x1   :  { %v43_v0 = vld [vmem:[%s295_s3 + $0x78] sm:$0xff]  ;;  %v42_v1 = vld [vmem:[%s295_s3 + $0x70] sm:$0xff]  ;;  %v41_v2 = vld [vmem:[%s295_s3 + $0x68] sm:$0xff] }
   0x2   :  { %44 = vmatpush.msra.mxu0 %v43_v0  ;;  %v40_v3 = vld [vmem:[%s295_s3 + $0x60] sm:$0xff]  ;;  %v26_v4 = vld [vmem:[%s294_s2 + $0x8] sm:$0xff]  ;;  %v39_v6 = vld [vmem:[%s295_s3 + $0x58] sm:$0xff] }
   0x3   :  { %v25_v5 = vld [vmem:[%s294_s2] sm:$0xff]  ;;  %82 = vmatpush.msra.mxu1 %v26_v4 }
   0x4   :  { %45 = vmatpush.msra.mxu0 %v42_v1  ;;  %v24_v7 = vld [vmem:[%s292_s0] sm:$0xff] }
   0x6   :  { %46 = vmatpush.msra.mxu0 %v41_v2 }
   0x8   :  { %47 = vmatpush.msra.mxu0 %v40_v3 }
   0x9   :  { %13 = vsyncpa [#allocation5], 0  ;;  %v38_v8 = vld [vmem:[%s295_s3 + $0x50] sm:$0xff]  ;;  %83 = vmatpush.msra.mxu1 %v25_v5  ;;  %v37_v9 = vld [vmem:[%s295_s3 + $0x48] sm:$0xff]  ;;  %s186_s13 = smov [#allocation4]   ;;  %s114_s16 = sshll.u32 %s298_s6, 4  ;;  %s115_s16 = int_to_ptr.hbm [resolvable:$true] %s114_s16 }
   0xa   :  { %48 = vmatpush.msra.mxu0 %v39_v6  ;;  %128 = vmatmul.msk.f32.vlgmr.msra.gmra.mxu1 %vm64_vm0, %v24_v7  ;;  %v36_v10 = vld [vmem:[%s295_s3 + $0x40] sm:$0xff]  ;;  %v35_v11 = vld [vmem:[%s295_s3 + $0x38] sm:$0xff]  ;;  %v34_v12 = vld [vmem:[%s295_s3 + $0x30] sm:$0xff]  ;;  %s112_s14 = sshll.u32 %s186_s13, 4  ;;  %s113_s14 = int_to_ptr.vmem [resolvable:$true] %s112_s14 }
   0xb   :  { %v33_v13 = vld [vmem:[%s295_s3 + $0x28] sm:$0xff]  ;;  %v32_v14 = vld [vmem:[%s295_s3 + $0x20] sm:$0xff]  ;;  %v31_v15 = vld [vmem:[%s295_s3 + $0x18] sm:$0xff] }
   0xc   :  { %49 = vmatpush.msra.mxu0 %v38_v8  ;;  %v30_v16 = vld [vmem:[%s295_s3 + $0x10] sm:$0xff]  ;;  %v29_v17 = vld [vmem:[%s295_s3 + $0x8] sm:$0xff]  ;;  %v28_v18 = vld [vmem:[%s295_s3] sm:$0xff] }
   0xd   :  { %v27_v19 = vld [vmem:[%s293_s1] sm:$0xff]  ;;  %s187_s1 = smov [#allocation2]  }
   0xe   :  { %50 = vmatpush.msra.mxu0 %v37_v9  ;;  %v131_v21 = vld [vmem:[%s296_s4] ss:$0 sm:$0xff]  ;;  %s101_s3 = sshll.u32 %s187_s1, 4  ;;  %s103_s4 = sshll.u32 %s297_s5, 4  ;;  %s102_s3 = int_to_ptr.vmem [resolvable:$true] %s101_s3  ;;  %s104_s4 = int_to_ptr.hbm [resolvable:$true] %s103_s4 }
  0x10   :  { %51 = vmatpush.msra.mxu0 %v36_v10 }
  0x12   :  { %52 = vmatpush.msra.mxu0 %v35_v11 }
  0x14   :  { %53 = vmatpush.msra.mxu0 %v34_v12 }
  0x16   :  { %54 = vmatpush.msra.mxu0 %v33_v13 }
  0x18   :  { %55 = vmatpush.msra.mxu0 %v32_v14 }
  0x1a   :  { %56 = vmatpush.msra.mxu0 %v31_v15 }
  0x1c   :  { %57 = vmatpush.msra.mxu0 %v30_v16 }
  0x1e   :  { %58 = vmatpush.msra.mxu0 %v29_v17 }
  0x20   :  { %59 = vmatpush.msra.mxu0 %v28_v18 }
  0x21   :  { %60 = vmatmul.f32.vlgmr.msra.gmra.mxu0 %v27_v19 }
  0x87   :  { %v85_v20 = vpop.f32.mrf.mxu1 }
  0x9e   :  { %v61_v22 = vpop.f32.mrf.mxu0 }
  0x9f   :  { %v86_v23 = vadd.f32 %v85_v20, %v61_v22 }
  0xa1   :  { %v92_v24 = vadd.f32 %v131_v21, %v86_v23 }
  0xa3   :  { %93 = vst [vmem:[#allocation4] sm:$0xff] %v92_v24  ;;  %132 = vtanh.f32 %v92_v24 }
  0xa4   :  { %117 = dma.vmem_to_hbm [thread:$0]  %s113_s14, 128, %s115_s16, [#allocation5]  }
  0xa9   :  { %v133_v25 = vpop.eup %132 }
  0xaa   :  { %95 = vst [vmem:[#allocation2] sm:$0xff] %v133_v25 }
  0xab   :  { %106 = dma.vmem_to_hbm [thread:$0]  %s102_s3, 128, %s104_s4, [#allocation3]  }
  0xac   :  { %182 = dma.done.wait [#allocation3], 128  }
  0xad   :  { %183 = vsyncadd [#allocation3], 4294967168 }
  0xae   :  { %184 = dma.done.wait [#allocation5], 128  }
  0xaf   :  { %185 = vsyncadd [#allocation5], 4294967168 }
  0xb0   :  { %126 = vsyncpa [#allocation3], 1 }
  0xb1   :  { %127 = vsyncpa [#allocation5], 1 }

</bundles_post_ra>
